<compile_context>
chip_gen: v7x
topology: tpu7x:2x2x1
jax: 0.10.0
libtpu: 0.0.40
codegen_flags: <defaults>
</compile_context>

<pallas_src>
import functools

import jax
import jax.numpy as jnp
from jax import lax
from jax.experimental import pallas as pl
from jax.experimental.pallas import tpu as pltpu

HIDDEN = 256


def value_fn_kernel(s_ref, w1_ref, b1_ref, w2_ref, b2_ref, w3t_ref, b3_ref, o_ref):
    # Layer 1: [tm, D](bf16) @ [D, 256](bf16) -> f32 acc, + b1, ReLU
    s = s_ref[...].astype(jnp.bfloat16)
    h1 = jnp.dot(s, w1_ref[...], preferred_element_type=jnp.float32)
    h1 = jnp.maximum(h1 + b1_ref[...], 0.0).astype(jnp.bfloat16)
    # Layer 2: [tm, 256] @ [256, 256] -> f32 acc, + b2, ReLU
    h2 = jnp.dot(h1, w2_ref[...], preferred_element_type=jnp.float32)
    h2 = jnp.maximum(h2 + b2_ref[...], 0.0).astype(jnp.bfloat16)
    # Value head, lane-dense: [1, 256] @ [tm, 256]^T -> [1, tm] (values packed along lanes)
    v = lax.dot_general(
        w3t_ref[...], h2,
        dimension_numbers=(((1,), (1,)), ((), ())),
        preferred_element_type=jnp.float32)
    b3 = b3_ref[0, 0]  # scalar bias from SMEM
    o_ref[...] = (v + b3).astype(o_ref.dtype)


def prepare_params(params):
    """One-time parameter prep: bf16 casts, head transpose, bias reshapes."""
    w1, b1, w2, b2, w3, b3 = params
    return (
        w1.astype(jnp.bfloat16),                         # [D, 256]
        b1.reshape(1, HIDDEN).astype(jnp.float32),       # [1, 256]
        w2.astype(jnp.bfloat16),                         # [256, 256]
        b2.reshape(1, HIDDEN).astype(jnp.float32),       # [1, 256]
        w3.reshape(HIDDEN, 1).T.astype(jnp.bfloat16),    # [1, 256]  (transposed head)
        b3.reshape(1, 1).astype(jnp.float32),            # [1, 1]    (SMEM scalar)
    )


@functools.partial(jax.jit, static_argnames=("tm",))
def value_function_forward(state, prepared_params, tm=512):
    """Fused 3-layer MLP value head. state [B, D] f32 -> value [B, 1] f32."""
    w1, b1, w2, b2, w3t, b3 = prepared_params
    B, D = state.shape

    # Static tile-size selection: single full-batch tile for small B, otherwise a
    # 128-aligned tile so multi-step grids satisfy the (8,128) block rules and keep
    # both v7x TensorCores busy via the "parallel" grid axis.
    if B <= tm:
        tm = B
    else:
        tm = max(128, (tm // 128) * 128)

    grid_m = pl.cdiv(B, tm)
    b_pad = grid_m * tm
    if b_pad != B:
        # Tail rows are computed on zero-padded state and sliced off below.
        state = jnp.pad(state, ((0, b_pad - B), (0, 0)))

    out = pl.pallas_call(
        value_fn_kernel,
        out_shape=jax.ShapeDtypeStruct((1, b_pad), jnp.float32),
        grid_spec=pltpu.PrefetchScalarGridSpec(
            num_scalar_prefetch=0,
            grid=(grid_m,),
            in_specs=[
                pl.BlockSpec((tm, D), lambda i: (i, 0)),           # state tile (f32)
                pl.BlockSpec((D, HIDDEN), lambda i: (0, 0)),       # W1 (bf16)
                pl.BlockSpec((1, HIDDEN), lambda i: (0, 0)),       # b1 (f32)
                pl.BlockSpec((HIDDEN, HIDDEN), lambda i: (0, 0)),  # W2 (bf16)
                pl.BlockSpec((1, HIDDEN), lambda i: (0, 0)),       # b2 (f32)
                pl.BlockSpec((1, HIDDEN), lambda i: (0, 0)),       # W3^T (bf16)
                pl.BlockSpec(memory_space=pltpu.MemorySpace.SMEM), # b3 scalar (f32)
            ],
            out_specs=pl.BlockSpec((1, tm), lambda i: (0, i)),     # lane-dense values
        ),
        compiler_params=pltpu.CompilerParams(
            dimension_semantics=("parallel",)),
    )(state, w1, b1, w2, b2, w3t, b3)

    return out[0, :B].reshape(B, 1)  # 4 B/row, trivial reshape


def init_params(state_dim, key):
    """Deterministic init mimicking PyTorch Linear's U(-1/sqrt(fan_in), 1/sqrt(fan_in))."""
    ks = jax.random.split(key, 6)

    def lin(kw, kb, fan_in, fan_out):
        bound = 1.0 / jnp.sqrt(fan_in)
        w = jax.random.uniform(kw, (fan_in, fan_out), jnp.float32, -bound, bound)
        b = jax.random.uniform(kb, (fan_out,), jnp.float32, -bound, bound)
        return w, b

    w1, b1 = lin(ks[0], ks[1], state_dim, HIDDEN)
    w2, b2 = lin(ks[2], ks[3], HIDDEN, HIDDEN)
    w3, b3 = lin(ks[4], ks[5], HIDDEN, 1)
    return (w1, b1, w2, b2, w3, b3)


def reference_forward(state, params):
    w1, b1, w2, b2, w3, b3 = params
    h1 = jnp.maximum(state @ w1 + b1, 0.0)
    h2 = jnp.maximum(h1 @ w2 + b2, 0.0)
    return h2 @ w3 + b3.reshape(1, 1)


if __name__ == "__main__":
    key = jax.random.PRNGKey(0)
    k_param, k_state = jax.random.split(key)

    batch = 8
    state_dim = 32

    params = init_params(state_dim, k_param)
    prepared = prepare_params(params)
    state = jax.random.normal(k_state, (batch, state_dim), jnp.float32)

    value = value_function_forward(state, prepared)
    value = jax.block_until_ready(value)

    ref = reference_forward(state, params)
    assert value.shape == (batch, 1), value.shape
    # bf16 MXU inputs (f32 accumulation) -> tolerance loosened vs. the pure-f32 reference.
    assert jnp.allclose(value, ref, atol=2e-2, rtol=2e-2), (
        f"max abs diff {jnp.max(jnp.abs(value - ref))}")

    print("KERNEL_OK")
</pallas_src>

<mosaic_0001>
module attributes {stable_mosaic.version = 11 : i64} {
  func.func @value_fn_kernel(%arg0: i32, %arg1: memref<8x32xf32, #tpu.memory_space<vmem>>, %arg2: memref<32x256xbf16, #tpu.memory_space<vmem>>, %arg3: memref<1x256xf32, #tpu.memory_space<vmem>>, %arg4: memref<256x256xbf16, #tpu.memory_space<vmem>>, %arg5: memref<1x256xf32, #tpu.memory_space<vmem>>, %arg6: memref<1x256xbf16, #tpu.memory_space<vmem>>, %arg7: memref<1x1xf32, #tpu.memory_space<smem>>, %arg8: memref<1x8xf32, #tpu.memory_space<vmem>>) attributes {dimension_semantics = [#tpu.dimension_semantics<parallel>], iteration_bounds = array<i64: 1>, scalar_prefetch = 0 : i64, scratch_operands = 0 : i64, tpu.core_type = #tpu.core_type<tc>, window_params = [{transform_indices = @transform_0, window_bounds = array<i64: 8, 32>}, {pipeline_mode = #tpu.pipeline_mode<synchronous>, transform_indices = @transform_1, window_bounds = array<i64: 32, 256>}, {pipeline_mode = #tpu.pipeline_mode<synchronous>, transform_indices = @transform_2, window_bounds = array<i64: 1, 256>}, {pipeline_mode = #tpu.pipeline_mode<synchronous>, transform_indices = @transform_3, window_bounds = array<i64: 256, 256>}, {pipeline_mode = #tpu.pipeline_mode<synchronous>, transform_indices = @transform_4, window_bounds = array<i64: 1, 256>}, {pipeline_mode = #tpu.pipeline_mode<synchronous>, transform_indices = @transform_5, window_bounds = array<i64: 1, 256>}, {transform_indices = @transform_6, window_bounds = array<i64: 1, 1>}, {transform_indices = @transform_7, window_bounds = array<i64: 1, 8>}]} {
    %c0 = arith.constant 0 : index
    %c0_0 = arith.constant 0 : index
    %0 = vector.load %arg1[%c0, %c0_0] : memref<8x32xf32, #tpu.memory_space<vmem>>, vector<8x32xf32>
    %1 = arith.truncf %0 : vector<8x32xf32> to vector<8x32xbf16>
    %c0_1 = arith.constant 0 : index
    %c0_2 = arith.constant 0 : index
    %2 = vector.load %arg2[%c0_1, %c0_2] : memref<32x256xbf16, #tpu.memory_space<vmem>>, vector<32x256xbf16>
    %cst = arith.constant dense<0.000000e+00> : vector<8x256xf32>
    %3 = tpu.matmul %1, %2, %cst {dimension_numbers = #tpu.dot_dimension_numbers<[1], [0], [0], [1], [0, 0, 1, 1], [], []>} : vector<8x32xbf16>, vector<32x256xbf16>, vector<8x256xf32> -> vector<8x256xf32>
    %c0_3 = arith.constant 0 : index
    %c0_4 = arith.constant 0 : index
    %4 = vector.load %arg3[%c0_3, %c0_4] : memref<1x256xf32, #tpu.memory_space<vmem>>, vector<1x256xf32>
    %5 = vector.broadcast %4 : vector<1x256xf32> to vector<8x256xf32>
    %6 = arith.addf %3, %5 : vector<8x256xf32>
    %cst_5 = arith.constant 0.000000e+00 : f32
    %7 = vector.broadcast %cst_5 : f32 to vector<8x256xf32>
    %8 = arith.maximumf %6, %7 : vector<8x256xf32>
    %9 = arith.truncf %8 : vector<8x256xf32> to vector<8x256xbf16>
    %c0_6 = arith.constant 0 : index
    %c0_7 = arith.constant 0 : index
    %10 = vector.load %arg4[%c0_6, %c0_7] : memref<256x256xbf16, #tpu.memory_space<vmem>>, vector<256x256xbf16>
    %cst_8 = arith.constant dense<0.000000e+00> : vector<8x256xf32>
    %11 = tpu.matmul %9, %10, %cst_8 {dimension_numbers = #tpu.dot_dimension_numbers<[1], [0], [0], [1], [0, 0, 1, 1], [], []>} : vector<8x256xbf16>, vector<256x256xbf16>, vector<8x256xf32> -> vector<8x256xf32>
    %c0_9 = arith.constant 0 : index
    %c0_10 = arith.constant 0 : index
    %12 = vector.load %arg5[%c0_9, %c0_10] : memref<1x256xf32, #tpu.memory_space<vmem>>, vector<1x256xf32>
    %13 = vector.broadcast %12 : vector<1x256xf32> to vector<8x256xf32>
    %14 = arith.addf %11, %13 : vector<8x256xf32>
    %cst_11 = arith.constant 0.000000e+00 : f32
    %15 = vector.broadcast %cst_11 : f32 to vector<8x256xf32>
    %16 = arith.maximumf %14, %15 : vector<8x256xf32>
    %17 = arith.truncf %16 : vector<8x256xf32> to vector<8x256xbf16>
    %c0_12 = arith.constant 0 : index
    %c0_13 = arith.constant 0 : index
    %18 = vector.load %arg6[%c0_12, %c0_13] : memref<1x256xbf16, #tpu.memory_space<vmem>>, vector<1x256xbf16>
    %cst_14 = arith.constant dense<0.000000e+00> : vector<1x8xf32>
    %19 = tpu.matmul %18, %17, %cst_14 {dimension_numbers = #tpu.dot_dimension_numbers<[1], [1], [0], [0], [0, 0, 1, 0], [], []>} : vector<1x256xbf16>, vector<8x256xbf16>, vector<1x8xf32> -> vector<1x8xf32>
    %c0_15 = arith.constant 0 : index
    %c0_16 = arith.constant 0 : index
    %20 = memref.load %arg7[%c0_15, %c0_16] : memref<1x1xf32, #tpu.memory_space<smem>>
    %21 = vector.broadcast %20 : f32 to vector<1x8xf32>
    %22 = arith.addf %19, %21 : vector<1x8xf32>
    %c0_17 = arith.constant 0 : index
    %c0_18 = arith.constant 0 : index
    %23 = vector.load %arg8[%c0_17, %c0_18] : memref<1x8xf32, #tpu.memory_space<vmem>>, vector<1x8xf32>
    tpu.vector_store %arg8[%c0_17, %c0_18], %22 {strides = array<i32>} : memref<1x8xf32, #tpu.memory_space<vmem>>, vector<1x8xf32>,
    return
  }
  func.func @transform_0(%arg0: i32) -> (i32, i32) {
    %c0_i32 = arith.constant 0 : i32
    %c0_i32_0 = arith.constant 0 : i32
    return %arg0, %c0_i32 : i32, i32
  }
  func.func @transform_1(%arg0: i32) -> (i32, i32) {
    %c0_i32 = arith.constant 0 : i32
    %c0_i32_0 = arith.constant 0 : i32
    %c0_i32_1 = arith.constant 0 : i32
    return %c0_i32, %c0_i32_0 : i32, i32
  }
  func.func @transform_2(%arg0: i32) -> (i32, i32) {
    %c0_i32 = arith.constant 0 : i32
    %c0_i32_0 = arith.constant 0 : i32
    %c0_i32_1 = arith.constant 0 : i32
    return %c0_i32, %c0_i32_0 : i32, i32
  }
  func.func @transform_3(%arg0: i32) -> (i32, i32) {
    %c0_i32 = arith.constant 0 : i32
    %c0_i32_0 = arith.constant 0 : i32
    %c0_i32_1 = arith.constant 0 : i32
    return %c0_i32, %c0_i32_0 : i32, i32
  }
  func.func @transform_4(%arg0: i32) -> (i32, i32) {
    %c0_i32 = arith.constant 0 : i32
    %c0_i32_0 = arith.constant 0 : i32
    %c0_i32_1 = arith.constant 0 : i32
    return %c0_i32, %c0_i32_0 : i32, i32
  }
  func.func @transform_5(%arg0: i32) -> (i32, i32) {
    %c0_i32 = arith.constant 0 : i32
    %c0_i32_0 = arith.constant 0 : i32
    %c0_i32_1 = arith.constant 0 : i32
    return %c0_i32, %c0_i32_0 : i32, i32
  }
  func.func @transform_6(%arg0: i32) -> (i32, i32) {
    %c0_i32 = arith.constant 0 : i32
    %c0_i32_0 = arith.constant 0 : i32
    %c0_i32_1 = arith.constant 0 : i32
    return %c0_i32, %c0_i32_0 : i32, i32
  }
  func.func @transform_7(%arg0: i32) -> (i32, i32) {
    %c0_i32 = arith.constant 0 : i32
    %c0_i32_0 = arith.constant 0 : i32
    return %c0_i32, %arg0 : i32, i32
  }
}

</mosaic_0001>

<bundles_post_ra>
// kernel: value_function_forward.1
= control target key start
LH: loop header
LB: loop body
LE: loop exit
PB: predicated region body
PF: predicated region fallthrough
CT: control target
= control target key end

     0   :  { %13 = vsyncpa [#allocation4], 0  ;;  %s798_s0 = inlined_call_operand.hbm [shape: f32[8,32], index: 0, kind: input, shape index: {}]   ;;  %s799_s1 = inlined_call_operand.hbm [shape: bf16[32,256], index: 1, kind: input, shape index: {}]   ;;  %s800_s2 = inlined_call_operand.vmem [shape: f32[1,256], index: 2, kind: input, shape index: {}]   ;;  %s801_s3 = inlined_call_operand.hbm [shape: bf16[256,256], index: 3, kind: input, shape index: {}]   ;;  %s802_s4 = inlined_call_operand.vmem [shape: f32[1,256], index: 4, kind: input, shape index: {}]   ;;  %s803_s5 = inlined_call_operand.vmem [shape: bf16[1,256], index: 5, kind: input, shape index: {}]   ;;  %s804_s6 = inlined_call_operand.<no memory space> [shape: f32[1,1], index: 6, kind: input, shape index: {}]   ;;  %s805_s7 = inlined_call_operand.hbm [shape: f32[1,8], index: 7, kind: output, shape index: {}]  }
   0x1   :  { %14 = vsyncpa [#allocation7], 0 }
   0x2   :  { %15 = vsyncpa [#allocation5], 0  ;;  %s684_s24 = smov [#allocation6]   ;;  %s590_s28 = scalar_lea.hbm %s799_s1, 512 }
   0x3   :  { %s31_s25 = sshll.u32 %s684_s24, 4  ;;  %p591_p0 = scmp.ne.s32.totalorder %s799_s1, %s590_s28  ;;  %s32_s25 = int_to_ptr.vmem [resolvable:$true] %s31_s25 }
   0x4   :  { %p594_p1 = scmp.lt.u32.totalorder %s590_s28, %s799_s1 }
   0x6   :  { %p596_p2 = pnand %p594_p1, %p591_p0 }
   0x8   :  { %599 = shalt.err (!%p596_p2)
}
   0x9   :  { %s600_s10 = scalar_lea.vmem %s32_s25, 512  ;;  %p605_p4 = scmp.lt.s32.totalorder %s32_s25, %s32_s25 }
   0xa   :  { %p601_p3 = scmp.ne.s32.totalorder %s32_s25, %s600_s10  ;;  %p606_p5 = scmp.lt.s32.totalorder %s600_s10, %s600_s10 }
   0xc   :  { %p607_p6 = por %p606_p5, %p605_p4 }
   0xe   :  { %p608_p7 = pnand %p607_p6, %p601_p3 }
  0x10   :  { %611 = shalt.err (!%p608_p7)
}
  0x11   :  { %s685_s11 = smov 128   ;;  %s686_s12 = smov 8  }
  0x12   :  { %37 = dma.hbm_to_vmem [thread:$0]  %s799_s1, 512, %s32_s25, [#allocation7], %s685_s11, %s685_s11, %s686_s12  }
  0x13   :  { %s687_s15 = smov [#allocation3]   ;;  %s688_s17 = smov [#allocation8]  }
  0x14   :  { %s22_s16 = sshll.u32 %s687_s15, 4  ;;  %s45_s18 = sshll.u32 %s688_s17, 4  ;;  %s23_s16 = int_to_ptr.vmem [resolvable:$true] %s22_s16  ;;  %s46_s18 = int_to_ptr.vmem [resolvable:$true] %s45_s18 }
  0x15   :  { %s612_s21 = scalar_lea.hbm %s798_s0, 128 }
  0x16   :  { %p613_p8 = scmp.ne.s32.totalorder %s798_s0, %s612_s21  ;;  %p616_p9 = scmp.lt.u32.totalorder %s612_s21, %s798_s0 }
  0x18   :  { %p618_p10 = pnand %p616_p9, %p613_p8 }
  0x1a   :  { %621 = shalt.err (!%p618_p10)
}
  0x1b   :  { %s622_s1 = scalar_lea.vmem %s23_s16, 128  ;;  %p627_p12 = scmp.lt.s32.totalorder %s23_s16, %s23_s16 }
  0x1c   :  { %p623_p11 = scmp.ne.s32.totalorder %s23_s16, %s622_s1  ;;  %p628_p13 = scmp.lt.s32.totalorder %s622_s1, %s622_s1 }
  0x1e   :  { %p629_p0 = por %p628_p13, %p627_p12 }
  0x20   :  { %p630_p1 = pnand %p629_p0, %p623_p11 }
  0x22   :  { %633 = shalt.err (!%p630_p1)
}
  0x23   :  { %25 = dma.hbm_to_vmem [thread:$0]  %s798_s0, 128, %s23_s16, [#allocation4]  }
  0x24   :  { %s634_s30 = scalar_lea.hbm %s801_s3, 4096 }
  0x25   :  { %p635_p2 = scmp.ne.s32.totalorder %s801_s3, %s634_s30  ;;  %p638_p3 = scmp.lt.u32.totalorder %s634_s30, %s801_s3 }
  0x27   :  { %p640_p4 = pnand %p638_p3, %p635_p2 }
  0x29   :  { %643 = shalt.err (!%p640_p4)
}
  0x2a   :  { %s644_s14 = scalar_lea.vmem %s46_s18, 4096  ;;  %p649_p6 = scmp.lt.s32.totalorder %s46_s18, %s46_s18 }
  0x2b   :  { %p645_p5 = scmp.ne.s32.totalorder %s46_s18, %s644_s14  ;;  %p650_p7 = scmp.lt.s32.totalorder %s644_s14, %s644_s14 }
  0x2d   :  { %p651_p8 = por %p650_p7, %p649_p6 }
  0x2f   :  { %p652_p9 = pnand %p651_p8, %p645_p5 }
  0x31   :  { %655 = shalt.err (!%p652_p9)
}
  0x32   :  { %51 = dma.hbm_to_vmem [thread:$0]  %s801_s3, 4096, %s46_s18, [#allocation7], %s685_s11, %s685_s11, %s686_s12  }
  0x33   :  { %678 = dma.done.wait [#allocation4], 128  }
  0x34   :  { %679 = vsyncadd [#allocation4], 4294967168 }
  0x35   :  { %680 = dma.done.wait [#allocation7], 4608  }
  0x36   :  { %681 = vsyncadd [#allocation7], 4294962688  ;;  %v689_v0 = vmov 0   ;;  %v536_v1 = vld [vmem:[#allocation6 + $0x4] ss:$8 sps:$4 sm:$0xff]   ;;  %v68_v5 = vld [vmem:[#allocation3] sm:$0xff]  ;;  %v76_v39 = vlaneseq }
  0x37   :  { %142 = vmatprep.mubr.bf16.mxu0 %v689_v0  ;;  %v538_v2 = vld [vmem:[#allocation6] ss:$8 sps:$4 sm:$0xff]   ;;  %110 = vmatprep.subr.bf16.mxu0 %v536_v1  ;;  %v539_v3 = vld [vmem:[#allocation6 + $0x14] ss:$8 sps:$4 sm:$0xff]   ;;  %v541_v4 = vld [vmem:[#allocation6 + $0x10] ss:$8 sps:$4 sm:$0xff]   ;;  %v69_v9 = vpack.c.bf16 %v68_v5, %v68_v5 }
  0x38   :  { %111 = vmatpush1.bf16.msra.mxu0 %v538_v2  ;;  %v542_v6 = vld [vmem:[#allocation8 + $0x4] ss:$8 sps:$4 sm:$0xff]   ;;  %v544_v7 = vld [vmem:[#allocation8] ss:$8 sps:$4 sm:$0xff]   ;;  %v545_v8 = vld [vmem:[#allocation8 + $0x14] ss:$8 sps:$4 sm:$0xff]  }
  0x39   :  { %112 = vmatprep.subr.bf16.mxu0 %v539_v3  ;;  %359 = vmatprep.subr.bf16.mxu1 %v542_v6  ;;  %v547_v10 = vld [vmem:[#allocation8 + $0x10] ss:$8 sps:$4 sm:$0xff]   ;;  %vm106_vm0 = vcmask 261120   ;;  %v548_v11 = vld [vmem:[#allocation8 + $0x24] ss:$8 sps:$4 sm:$0xff]   ;;  %v77_v40 = vshrl.u32 %v76_v39, 7 }
  0x3a   :  { %360 = vmatpush1.bf16.msra.mxu1 %v544_v7  ;;  %v550_v12 = vld [vmem:[#allocation8 + $0x20] ss:$8 sps:$4 sm:$0xff]   ;;  %v551_v13 = vld [vmem:[#allocation8 + $0x34] ss:$8 sps:$4 sm:$0xff]   ;;  %v553_v14 = vld [vmem:[#allocation8 + $0x30] ss:$8 sps:$4 sm:$0xff]  }
  0x3b   :  { %361 = vmatprep.subr.bf16.mxu1 %v545_v8  ;;  %v554_v15 = vld [vmem:[#allocation8 + $0x44] ss:$8 sps:$4 sm:$0xff]   ;;  %v556_v16 = vld [vmem:[#allocation8 + $0x40] ss:$8 sps:$4 sm:$0xff]   ;;  %v557_v17 = vld [vmem:[#allocation8 + $0x54] ss:$8 sps:$4 sm:$0xff]  }
  0x3c   :  { %113 = vmatpush1.bf16.msra.mxu0 %v541_v4  ;;  %v559_v18 = vld [vmem:[#allocation8 + $0x50] ss:$8 sps:$4 sm:$0xff]   ;;  %v560_v19 = vld [vmem:[#allocation8 + $0x64] ss:$8 sps:$4 sm:$0xff]   ;;  %v562_v20 = vld [vmem:[#allocation8 + $0x60] ss:$8 sps:$4 sm:$0xff]  }
  0x3d   :  { %v563_v21 = vld [vmem:[#allocation8 + $0x74] ss:$8 sps:$4 sm:$0xff]   ;;  %v565_v22 = vld [vmem:[#allocation8 + $0x70] ss:$8 sps:$4 sm:$0xff]   ;;  %v566_v23 = vld [vmem:[#allocation8 + $0x84] ss:$8 sps:$4 sm:$0xff]  }
  0x3e   :  { %362 = vmatpush1.bf16.msra.mxu1 %v547_v10  ;;  %v568_v24 = vld [vmem:[#allocation8 + $0x80] ss:$8 sps:$4 sm:$0xff]   ;;  %v569_v25 = vld [vmem:[#allocation8 + $0x94] ss:$8 sps:$4 sm:$0xff]   ;;  %v571_v26 = vld [vmem:[#allocation8 + $0x90] ss:$8 sps:$4 sm:$0xff]  }
  0x3f   :  { %494 = vmatmul.mubr.msk.bf16.vlgmr.msra.gmra.mrb[0].mxu0 %vm106_vm0, %v69_v9  ;;  %363 = vmatprep.subr.bf16.mxu1 %v548_v11  ;;  %v572_v27 = vld [vmem:[#allocation8 + $0xa4] ss:$8 sps:$4 sm:$0xff]   ;;  %v574_v28 = vld [vmem:[#allocation8 + $0xa0] ss:$8 sps:$4 sm:$0xff]   ;;  %v575_v29 = vld [vmem:[#allocation8 + $0xb4] ss:$8 sps:$4 sm:$0xff]  }
  0x40   :  { %v577_v30 = vld [vmem:[#allocation8 + $0xb0] ss:$8 sps:$4 sm:$0xff]   ;;  %v578_v31 = vld [vmem:[#allocation8 + $0xc4] ss:$8 sps:$4 sm:$0xff]   ;;  %v580_v32 = vld [vmem:[#allocation8 + $0xc0] ss:$8 sps:$4 sm:$0xff]  }
  0x41   :  { %v581_v33 = vld [vmem:[#allocation8 + $0xd4] ss:$8 sps:$4 sm:$0xff]   ;;  %v583_v34 = vld [vmem:[#allocation8 + $0xd0] ss:$8 sps:$4 sm:$0xff]   ;;  %v584_v35 = vld [vmem:[#allocation8 + $0xe4] ss:$8 sps:$4 sm:$0xff]  }
  0x42   :  { %364 = vmatpush1.bf16.msra.mxu1 %v550_v12  ;;  %v586_v36 = vld [vmem:[#allocation8 + $0xe0] ss:$8 sps:$4 sm:$0xff]   ;;  %v587_v37 = vld [vmem:[#allocation8 + $0xf4] ss:$8 sps:$4 sm:$0xff]   ;;  %v589_v38 = vld [vmem:[#allocation8 + $0xf0] ss:$8 sps:$4 sm:$0xff]  }
  0x43   :  { %365 = vmatprep.subr.bf16.mxu1 %v551_v13  ;;  %v78_v41 = vsub.s32 0, %v77_v40  ;;  %v74_v42 = vld [vmem:[%s800_s2] sm:$0x3]  ;;  %v82_v43 = vsub.s32 1, %v77_v40  ;;  %v690_v56 = vmov 1966171168   ;;  %v406_v13 = vstv %s804_s6 }
  0x44   :  { %v417_v57 = vunpack.c.l.s4 %v690_v56  ;;  %v527_v58 = vld.sshfl [vmem:[%s803_s5] sm:$0x11 pattern:$0x75316420]  ;;  %vm472_vm1 = vcmask 57344  }
  0x45   :  { %v79_v44 = vrot.slane %v74_v42, %v78_v41  ;;  %v83_v45 = vrot.slane %v74_v42, %v82_v43  ;;  %v415_v60 = vcombine.high %v527_v58, %v527_v58  ;;  %v187_v0 = vld [vmem:[%s802_s4] sm:$0x3]  ;;  %s691_s4 = smov [#allocation9]  }
  0x46   :  { %366 = vmatpush1.bf16.msra.mxu1 %v553_v14  ;;  %v418_v59 = vunpack.c.0.s8 %v417_v57  ;;  %v192_v1 = vrot.slane %v187_v0, %v78_v41  ;;  %v196_v2 = vrot.slane %v187_v0, %v82_v43  ;;  %s480_s19 = sshll.u32 %s691_s4, 4  ;;  %s481_s19 = int_to_ptr.vmem [resolvable:$true] %s480_s19 }
  0x47   :  { %367 = vmatprep.subr.bf16.mxu1 %v554_v15  ;;  %s656_s20 = scalar_lea.vmem %s481_s19, 16  ;;  %s660_s21 = scalar_lea.vmem %s481_s19, 32 }
  0x48   :  { %v421_v61 = vsub.s32 %v418_v59, %v77_v40  ;;  %p657_p10 = scmp.ne.s32.totalorder %s481_s19, %s656_s20  ;;  %p661_p11 = scmp.lt.s32.totalorder %s481_s19, %s481_s19 }
  0x49   :  { %p662_p12 = scmp.lt.s32.totalorder %s660_s21, %s656_s20 }
  0x4a   :  { %368 = vmatpush1.bf16.msra.mxu1 %v556_v16  ;;  %v429_v62 = vrot.slane %v415_v60, %v421_v61  ;;  %v422_v63 = vrot.slane %v527_v58, %v421_v61 }
  0x4b   :  { %369 = vmatprep.subr.bf16.mxu1 %v557_v17  ;;  %p663_p13 = por %p662_p12, %p661_p11 }
  0x4c   :  { %464 = vmatprep.mubr.bf16.mxu0 %v429_v62 }
  0x4d   :  { %p664_p0 = pnand %p663_p13, %p657_p10 }
  0x4e   :  { %370 = vmatpush1.bf16.msra.mxu1 %v559_v18 }
  0x4f   :  { %371 = vmatprep.subr.bf16.mxu1 %v560_v19 }
  0x52   :  { %372 = vmatpush1.bf16.msra.mxu1 %v562_v20 }
  0x53   :  { %373 = vmatprep.subr.bf16.mxu1 %v563_v21 }
  0x56   :  { %374 = vmatpush1.bf16.msra.mxu1 %v565_v22 }
  0x57   :  { %375 = vmatprep.subr.bf16.mxu1 %v566_v23 }
  0x5a   :  { %376 = vmatpush1.bf16.msra.mxu1 %v568_v24 }
  0x5b   :  { %377 = vmatprep.subr.bf16.mxu1 %v569_v25 }
  0x5e   :  { %378 = vmatpush1.bf16.msra.mxu1 %v571_v26 }
  0x5f   :  { %379 = vmatprep.subr.bf16.mxu1 %v572_v27 }
  0x62   :  { %380 = vmatpush1.bf16.msra.mxu1 %v574_v28 }
  0x63   :  { %381 = vmatprep.subr.bf16.mxu1 %v575_v29 }
  0x66   :  { %382 = vmatpush1.bf16.msra.mxu1 %v577_v30 }
  0x67   :  { %383 = vmatprep.subr.bf16.mxu1 %v578_v31 }
  0x6a   :  { %384 = vmatpush1.bf16.msra.mxu1 %v580_v32 }
  0x6b   :  { %385 = vmatprep.subr.bf16.mxu1 %v581_v33 }
  0x6e   :  { %386 = vmatpush1.bf16.msra.mxu1 %v583_v34 }
  0x6f   :  { %387 = vmatprep.subr.bf16.mxu1 %v584_v35 }
  0x72   :  { %388 = vmatpush1.bf16.msra.mxu1 %v586_v36 }
  0x73   :  { %389 = vmatprep.subr.bf16.mxu1 %v587_v37 }
  0x76   :  { %390 = vmatpush1.bf16.msra.mxu1 %v589_v38 }
 0x112   :  { %v144_v46 = vpop.f32.mrb[0].mxu0 }
 0x113   :  { %v145_v47 = vadd.f32 %v144_v46, %v79_v44  ;;  %v146_v48 = vpop.f32.mrb[1].mxu0 }
 0x114   :  { %v147_v49 = vadd.f32 %v146_v48, %v83_v45  ;;  %v148_v50 = vpop.f32.mrb[2].mxu0 }
 0x115   :  { %v151_v51 = vmax.f32 %v145_v47, 0.0  ;;  %v149_v52 = vpop.f32.mrb[3].mxu0 }
 0x116   :  { %v152_v53 = vmax.f32 %v147_v49, 0.0 }
 0x117   :  { %v153_v55 = vpack.c.bf16 %v151_v51, %v151_v51 }
 0x118   :  { %v154_v54 = vpack.c.bf16 %v152_v53, %v152_v53 }
 0x11a   :  { %391 = vmatprep.mubr.bf16.mxu1 %v154_v54 }
 0x11b   :  { %392 = vmatmul.mubr.bf16.vlgmr.msra.gmra.mrb[0].mxu1 %v153_v55 }
 0x1ee   :  { %v393_v3 = vpop.f32.mrb[0].mxu1 }
 0x1ef   :  { %v394_v4 = vadd.f32 %v393_v3, %v192_v1  ;;  %v395_v5 = vpop.f32.mrb[1].mxu1 }
 0x1f0   :  { %v396_v6 = vadd.f32 %v395_v5, %v196_v2  ;;  %v397_v7 = vpop.f32.mrb[2].mxu1 }
 0x1f1   :  { %v400_v8 = vmax.f32 %v394_v4, 0.0  ;;  %v398_v9 = vpop.f32.mrb[3].mxu1 }
 0x1f2   :  { %v401_v10 = vmax.f32 %v396_v6, 0.0 }
 0x1f3   :  { %v402_v12 = vpack.c.bf16 %v400_v8, %v400_v8 }
 0x1f4   :  { %v403_v11 = vpack.c.bf16 %v401_v10, %v401_v10 }
 0x1f6   :  { %432 = vmatprep.subr.bf16.mxu0 %v403_v11 }
 0x1f7   :  { %433 = vmatpush1.bf16.xpose.msra.mxu0 %v402_v12 }
 0x1fe   :  { %465 = vmatmul.mubr.bf16.vlgmr.msra.gmra.mrb[4].mxu0 %v422_v63 }
 0x2d1   :  { %v466_v14 = vpop.f32.mrb[4].mxu0 }
 0x2d2   :  { %v467_v15 = vadd.f32 %v466_v14, %v406_v13  ;;  %v468_v16 = vpop.f32.mrb[5].mxu0 }
 0x2d3   :  { %v469_v17 = vpop.f32.mrb[6].mxu0 }
 0x2d4   :  { %v470_v18 = vpop.f32.mrb[7].mxu0  ;;  %473 = vst.msk [vmem:[#allocation9] sm:$0x1] %vm472_vm1, %v467_v15 }
 0x2d5   :  { %667 = shalt.err (!%p664_p0)
}
 0x2d6   :  { %s668_s23 = scalar_lea.hbm %s805_s7, 16 }
 0x2d7   :  { %p669_p1 = scmp.ne.s32.totalorder %s805_s7, %s668_s23  ;;  %p672_p2 = scmp.lt.u32.totalorder %s668_s23, %s805_s7 }
 0x2d9   :  { %p674_p3 = pnand %p672_p2, %p669_p1 }
 0x2db   :  { %677 = shalt.err (!%p674_p3)
}
 0x2dc   :  { %483 = dma.vmem_to_hbm [thread:$0]  %s481_s19, 16, %s805_s7, [#allocation5]  }
 0x2dd   :  { %682 = dma.done.wait [#allocation5], 16  }
 0x2de   :  { %683 = vsyncadd [#allocation5], 4294967280 }
 0x2df   :  { %487 = vsyncpa [#allocation4], 1 }
 0x2e0   :  { %488 = vsyncpa [#allocation7], 1 }
 0x2e1   :  { %489 = vsyncpa [#allocation5], 1 }

</bundles_post_ra>
